<compile_context>
chip_gen: v5e
topology: v5e:2x2
jax: 0.10.0
libtpu: 0.0.40
codegen_flags: <defaults>
</compile_context>

<pallas_src>
import functools

import jax
import jax.numpy as jnp
from jax import lax
from jax.experimental import pallas as pl
from jax.experimental.pallas import tpu as pltpu


# ----------------------------- hyper-parameters ------------------------------
class Opt:
    queue_size = 64
    momentum = 0.999
    temperature = 0.05
    label_smoothing = 0.1
    norm_doc = True
    norm_query = True
    moco_train_mode_encoder_k = False
    projection_size = 32          # == hidden size of the synthetic encoder


B, S, H, V = 4, 8, 32, 50        # batch, seq-len, hidden, vocab
P, K = Opt.projection_size, Opt.queue_size
MARGIN = 1.0                     # margin_ranking_loss margin in TimeMoCo2.forward
ALPHA = 0.8                      # loss / logits mixing coefficient
VPAD = -(-V // 8) * 8            # vocab padded to a sublane multiple for the MXU


# ------------------------------ fused kernel ---------------------------------
def _timemoco2_fused_kernel(tokens_ref, mask_ref, table_ref, w_ref, b_ref,
                            queues_ref, out_ref, *,
                            temperature, label_smoothing, margin, alpha,
                            norm_query, norm_doc):
    nb, seq = tokens_ref.shape            # nb = 3*B  (q, p, wp stacked)
    vpad = table_ref.shape[0]
    k = queues_ref.shape[1] // 2          # queue size
    b = nb // 3

    tok = tokens_ref[...]                 # (3B, S) int32
    msk = mask_ref[...]                   # (3B, S) f32

    # --- embedding gather + masked mean pool, fused as counts @ table (MXU) ---
    vid = lax.broadcasted_iota(jnp.int32, (nb, seq, vpad), 2)
    onehot = (tok[:, :, None] == vid).astype(jnp.float32)            # (3B,S,V)
    counts = jnp.sum(onehot * msk[:, :, None], axis=1)               # (3B,V)
    pooled = jnp.dot(counts, table_ref[...],
                     preferred_element_type=jnp.float32)             # (3B,H)
    inv_len = pl.reciprocal(jnp.sum(msk, axis=1, keepdims=True), approx=False)
    pooled = pooled * inv_len

    # --- projection head (one MXU matmul for all three encoders) ---
    proj = jnp.dot(pooled, w_ref[...],
                   preferred_element_type=jnp.float32) + b_ref[...]  # (3B,P)

    # --- optional L2 normalize (rsqrt -> EUP slot) ---
    def l2norm(x):
        ss = jnp.sum(x * x, axis=-1, keepdims=True)
        return x * lax.rsqrt(jnp.maximum(ss, 1e-24))

    if norm_query and norm_doc:
        proj = l2norm(proj)
    elif norm_query:
        proj = jnp.concatenate([l2norm(proj[:b]), proj[b:]], axis=0)
    elif norm_doc:
        proj = jnp.concatenate([proj[:b], l2norm(proj[b:])], axis=0)

    q = proj[:b]                          # (B, P)
    p = proj[b:2 * b]                     # (B, P)
    wp = proj[2 * b:]                     # (B, P)

    # --- MoCo logits: fold 1/T into q, one lane-dense (B, 2K) MXU matmul ---
    qs = q * (1.0 / temperature)
    l_pos_p = jnp.sum(qs * p, axis=-1, keepdims=True)                # (B,1)
    l_pos_wp = jnp.sum(qs * wp, axis=-1, keepdims=True)              # (B,1)
    l_neg = jnp.dot(qs, queues_ref[...],
                    preferred_element_type=jnp.float32)              # (B,2K)=(4,128)
    l_neg_p = l_neg[:, :k]
    l_neg_wp = l_neg[:, k:]

    n_cls = k + 1
    eps = label_smoothing

    def smoothed_ce(l_pos, l_neg_blk):
        # logits = cat([l_pos, l_neg]); CE against label 0, label-smoothed.
        m = jnp.maximum(jnp.max(l_neg_blk, axis=-1, keepdims=True), l_pos)
        se = jnp.exp(l_pos - m) + jnp.sum(jnp.exp(l_neg_blk - m),
                                          axis=-1, keepdims=True)
        lse = m + jnp.log(se)                                        # (B,1)
        logp_pos = l_pos - lse
        sum_logp = (l_pos + jnp.sum(l_neg_blk, axis=-1, keepdims=True)) - n_cls * lse
        li = -((1.0 - eps) * logp_pos + (eps / n_cls) * sum_logp)    # (B,1)
        return jnp.mean(li)

    p_loss = smoothed_ce(l_pos_p, l_neg_p)
    wp_loss = smoothed_ce(l_pos_wp, l_neg_wp)

    # margin_ranking_loss(wp_loss, p_loss, target=1, margin): max(0, -(x1-x2)+m)
    rank_loss = jnp.maximum(0.0, -(wp_loss - p_loss) + margin)
    loss = alpha * p_loss + (1.0 - alpha) * wp_loss + rank_loss

    # --- iter_stats scalars ---
    mix_pos = alpha * l_pos_p + (1.0 - alpha) * l_pos_wp             # (B,1)
    mix_neg = alpha * l_neg_p + (1.0 - alpha) * l_neg_wp             # (B,K)
    correct = (mix_pos >= jnp.max(mix_neg, axis=-1, keepdims=True)).astype(jnp.float32)
    accuracy = 100.0 * jnp.mean(correct)

    def std_mean(x):   # torch.std(x, dim=0).mean()  (unbiased, ddof=1)
        mu = jnp.mean(x, axis=0, keepdims=True)
        var = jnp.sum((x - mu) * (x - mu), axis=0, keepdims=True) / (b - 1)
        return jnp.mean(jnp.sqrt(var))

    out_ref[0] = loss
    out_ref[1] = p_loss
    out_ref[2] = wp_loss
    out_ref[3] = rank_loss
    out_ref[4] = accuracy
    out_ref[5] = std_mean(q)
    out_ref[6] = std_mean(p)
    out_ref[7] = std_mean(wp)


# --------------------------------- forward -----------------------------------
@jax.jit
def time_moco2_forward(params, q_tokens, q_mask, k_tokens, k_mask,
                       p_tokens, p_mask, wp_tokens, wp_mask):
    # k_tokens / k_mask accepted but unused, exactly like the PyTorch forward.
    del k_tokens, k_mask

    # Batch the three distinct encodes into one (3B, S) block.
    tokens_all = jnp.concatenate([q_tokens, p_tokens, wp_tokens], axis=0).astype(jnp.int32)
    mask_all = jnp.concatenate([q_mask, p_mask, wp_mask], axis=0).astype(jnp.float32)
    # Pad the embedding table's vocab axis to a sublane multiple (zero rows).
    table = jnp.pad(params["emb"], ((0, VPAD - params["emb"].shape[0]), (0, 0)))
    # Concatenate the two negative queues along K -> (P, 2K) = (32, 128), lane-dense.
    queues = jnp.concatenate([params["p_queue"], params["wp_queue"]], axis=1)

    out = pl.pallas_call(
        functools.partial(_timemoco2_fused_kernel,
                          temperature=Opt.temperature,
                          label_smoothing=Opt.label_smoothing,
                          margin=MARGIN, alpha=ALPHA,
                          norm_query=Opt.norm_query, norm_doc=Opt.norm_doc),
        out_shape=jax.ShapeDtypeStruct((8,), jnp.float32),
        in_specs=[pl.BlockSpec(memory_space=pltpu.MemorySpace.VMEM)] * 6,
        out_specs=pl.BlockSpec(memory_space=pltpu.MemorySpace.SMEM),
    )(tokens_all, mask_all, table, params["w"], params["b"].reshape(1, -1), queues)

    loss = out[0]
    iter_stats = {
        "p_loss": out[1], "wp_loss": out[2], "rank_loss": out[3], "all_loss": out[0],
        "accuracy": out[4], "stdq": out[5], "stdp": out[6], "stdwp": out[7],
    }
    # TODO(synk): momentum update of encoder_k_p/encoder_k_wp, queue
    # dequeue/enqueue (+ queue_ptr buffers) and dist-gather are training-mode
    # side effects (stats_prefix=='train') outside the default forward path.
    return loss, iter_stats


# ------------------------------ pure-JAX reference ----------------------------
def _ref_forward(params, q_tokens, q_mask, p_tokens, p_mask, wp_tokens, wp_mask):
    def enc(tok, msk, normalize):
        e = params["emb"][tok]
        m = msk.astype(jnp.float32)
        pooled = (e * m[:, :, None]).sum(1) / m.sum(1, keepdims=True)
        proj = pooled @ params["w"] + params["b"]
        if normalize:
            proj = proj / jnp.maximum(
                jnp.linalg.norm(proj, axis=-1, keepdims=True), 1e-12)
        return proj

    q = enc(q_tokens, q_mask, Opt.norm_query)
    p = enc(p_tokens, p_mask, Opt.norm_doc)
    wp = enc(wp_tokens, wp_mask, Opt.norm_doc)

    def logits(qv, kv, queue):
        l_pos = jnp.einsum("nc,nc->n", qv, kv)[:, None]
        l_neg = qv @ queue
        return jnp.concatenate([l_pos, l_neg], axis=1) / Opt.temperature

    def ce(lg):
        logp = jax.nn.log_softmax(lg, axis=-1)
        n_cls = lg.shape[1]
        eps = Opt.label_smoothing
        li = -((1 - eps) * logp[:, 0] + (eps / n_cls) * logp.sum(-1))
        return li.mean()

    p_loss = ce(logits(q, p, params["p_queue"]))
    wp_loss = ce(logits(q, wp, params["wp_queue"]))
    rank_loss = jnp.maximum(0.0, -(wp_loss - p_loss) + MARGIN)
    loss = ALPHA * p_loss + (1.0 - ALPHA) * wp_loss + rank_loss
    return loss, p_loss, wp_loss, rank_loss


# ----------------------------------- main -------------------------------------
if __name__ == "__main__":
    key = jax.random.PRNGKey(0)
    k_emb, k_w, k_b, k_pq, k_wpq, k_qt, k_pt, k_wpt = jax.random.split(key, 8)

    params = {
        "emb": jax.random.normal(k_emb, (V, H), jnp.float32) * 0.02,
        "w": jax.random.normal(k_w, (H, P), jnp.float32) * 0.1,
        "b": jax.random.normal(k_b, (P,), jnp.float32) * 0.01,
        "p_queue": None,
        "wp_queue": None,
    }
    # buffers: randn(P, K) normalized along dim 0 (projection dim)
    pq = jax.random.normal(k_pq, (P, K), jnp.float32)
    wpq = jax.random.normal(k_wpq, (P, K), jnp.float32)
    params["p_queue"] = pq / jnp.linalg.norm(pq, axis=0, keepdims=True)
    params["wp_queue"] = wpq / jnp.linalg.norm(wpq, axis=0, keepdims=True)

    q_tokens = jax.random.randint(k_qt, (B, S), 0, V, jnp.int32)
    p_tokens = jax.random.randint(k_pt, (B, S), 0, V, jnp.int32)
    wp_tokens = jax.random.randint(k_wpt, (B, S), 0, V, jnp.int32)
    k_tokens = p_tokens                      # unused by forward (matches PyTorch)
    # masks: first few positions valid
    pos = jnp.arange(S)[None, :]
    q_mask = (pos < jnp.array([[8], [6], [5], [7]])).astype(jnp.int32)
    p_mask = (pos < jnp.array([[7], [8], [4], [6]])).astype(jnp.int32)
    wp_mask = (pos < jnp.array([[5], [7], [8], [6]])).astype(jnp.int32)
    k_mask = p_mask

    loss, iter_stats = time_moco2_forward(params, q_tokens, q_mask, k_tokens,
                                          k_mask, p_tokens, p_mask,
                                          wp_tokens, wp_mask)
    loss = jax.block_until_ready(loss)

    ref_loss, ref_p, ref_wp, ref_rank = _ref_forward(
        params, q_tokens, q_mask, p_tokens, p_mask, wp_tokens, wp_mask)

    assert jnp.isfinite(loss), "non-finite loss"
    assert jnp.allclose(loss, ref_loss, rtol=1e-4, atol=1e-4), (loss, ref_loss)
    assert jnp.allclose(iter_stats["p_loss"], ref_p, rtol=1e-4, atol=1e-4)
    assert jnp.allclose(iter_stats["wp_loss"], ref_wp, rtol=1e-4, atol=1e-4)
    assert jnp.allclose(iter_stats["rank_loss"], ref_rank, rtol=1e-4, atol=1e-4)
    print("KERNEL_OK")
</pallas_src>

<mosaic_0001>
module attributes {stable_mosaic.version = 11 : i64} {
  func.func @_timemoco2_fused_kernel(%arg0: memref<12x8xi32, #tpu.memory_space<vmem>>, %arg1: memref<12x8xf32, #tpu.memory_space<vmem>>, %arg2: memref<56x32xf32, #tpu.memory_space<vmem>>, %arg3: memref<32x32xf32, #tpu.memory_space<vmem>>, %arg4: memref<1x32xf32, #tpu.memory_space<vmem>>, %arg5: memref<32x128xf32, #tpu.memory_space<vmem>>, %arg6: memref<8xf32, #tpu.memory_space<smem>>) attributes {dimension_semantics = [], scalar_prefetch = 0 : i64, scratch_operands = 0 : i64, tpu.core_type = #tpu.core_type<tc>} {
    %c0 = arith.constant 0 : index
    %c0_0 = arith.constant 0 : index
    %0 = vector.load %arg0[%c0, %c0_0] : memref<12x8xi32, #tpu.memory_space<vmem>>, vector<12x8xi32>
    %c0_1 = arith.constant 0 : index
    %c0_2 = arith.constant 0 : index
    %1 = vector.load %arg1[%c0_1, %c0_2] : memref<12x8xf32, #tpu.memory_space<vmem>>, vector<12x8xf32>
    %2 = tpu.iota {dimensions = array<i32: 2>} : vector<12x8x56xi32>
    %3 = vector.shape_cast %0 : vector<12x8xi32> to vector<12x8x1xi32>
    %4 = vector.broadcast %3 : vector<12x8x1xi32> to vector<12x8x56xi32>
    %5 = arith.cmpi eq, %4, %2 : vector<12x8x56xi32>
    %6 = arith.extui %5 : vector<12x8x56xi1> to vector<12x8x56xi32>
    %7 = arith.sitofp %6 : vector<12x8x56xi32> to vector<12x8x56xf32>
    %8 = vector.shape_cast %1 : vector<12x8xf32> to vector<12x8x1xf32>
    %9 = vector.broadcast %8 : vector<12x8x1xf32> to vector<12x8x56xf32>
    %10 = arith.mulf %7, %9 : vector<12x8x56xf32>
    %cst = arith.constant dense<0.000000e+00> : vector<12x56xf32>
    %11 = vector.multi_reduction <add>, %10, %cst [1] : vector<12x8x56xf32> to vector<12x56xf32>
    %c0_3 = arith.constant 0 : index
    %c0_4 = arith.constant 0 : index
    %12 = vector.load %arg2[%c0_3, %c0_4] : memref<56x32xf32, #tpu.memory_space<vmem>>, vector<56x32xf32>
    %cst_5 = arith.constant dense<0.000000e+00> : vector<12x32xf32>
    %13 = tpu.matmul %11, %12, %cst_5 {dimension_numbers = #tpu.dot_dimension_numbers<[1], [0], [0], [1], [0, 0, 1, 1], [], []>} : vector<12x56xf32>, vector<56x32xf32>, vector<12x32xf32> -> vector<12x32xf32>
    %cst_6 = arith.constant dense<0.000000e+00> : vector<12xf32>
    %14 = vector.multi_reduction <add>, %1, %cst_6 [1] : vector<12x8xf32> to vector<12xf32>
    %15 = vector.shape_cast %14 : vector<12xf32> to vector<12x1xf32>
    %16 = tpu.reciprocal %15 : vector<12x1xf32> -> vector<12x1xf32>
    %17 = vector.broadcast %16 : vector<12x1xf32> to vector<12x32xf32>
    %18 = arith.mulf %13, %17 : vector<12x32xf32>
    %c0_7 = arith.constant 0 : index
    %c0_8 = arith.constant 0 : index
    %19 = vector.load %arg3[%c0_7, %c0_8] : memref<32x32xf32, #tpu.memory_space<vmem>>, vector<32x32xf32>
    %cst_9 = arith.constant dense<0.000000e+00> : vector<12x32xf32>
    %20 = tpu.matmul %18, %19, %cst_9 {dimension_numbers = #tpu.dot_dimension_numbers<[1], [0], [0], [1], [0, 0, 1, 1], [], []>} : vector<12x32xf32>, vector<32x32xf32>, vector<12x32xf32> -> vector<12x32xf32>
    %c0_10 = arith.constant 0 : index
    %c0_11 = arith.constant 0 : index
    %21 = vector.load %arg4[%c0_10, %c0_11] : memref<1x32xf32, #tpu.memory_space<vmem>>, vector<1x32xf32>
    %22 = vector.broadcast %21 : vector<1x32xf32> to vector<12x32xf32>
    %23 = arith.addf %20, %22 : vector<12x32xf32>
    %24 = arith.mulf %23, %23 : vector<12x32xf32>
    %cst_12 = arith.constant dense<0.000000e+00> : vector<12xf32>
    %25 = vector.multi_reduction <add>, %24, %cst_12 [1] : vector<12x32xf32> to vector<12xf32>
    %26 = vector.shape_cast %25 : vector<12xf32> to vector<12x1xf32>
    %cst_13 = arith.constant 1.000000e-24 : f32
    %27 = vector.broadcast %cst_13 : f32 to vector<12x1xf32>
    %28 = arith.maximumf %26, %27 : vector<12x1xf32>
    %29 = math.rsqrt %28 : vector<12x1xf32>
    %30 = vector.broadcast %29 : vector<12x1xf32> to vector<12x32xf32>
    %31 = arith.mulf %23, %30 : vector<12x32xf32>
    %32 = vector.extract_strided_slice %31 {offsets = [0, 0], sizes = [4, 32], strides = [1, 1]} : vector<12x32xf32> to vector<4x32xf32>
    %33 = vector.extract_strided_slice %31 {offsets = [4, 0], sizes = [4, 32], strides = [1, 1]} : vector<12x32xf32> to vector<4x32xf32>
    %34 = vector.extract_strided_slice %31 {offsets = [8, 0], sizes = [4, 32], strides = [1, 1]} : vector<12x32xf32> to vector<4x32xf32>
    %cst_14 = arith.constant 2.000000e+01 : f32
    %35 = vector.broadcast %cst_14 : f32 to vector<4x32xf32>
    %36 = arith.mulf %32, %35 : vector<4x32xf32>
    %37 = arith.mulf %36, %33 : vector<4x32xf32>
    %cst_15 = arith.constant dense<0.000000e+00> : vector<4xf32>
    %38 = vector.multi_reduction <add>, %37, %cst_15 [1] : vector<4x32xf32> to vector<4xf32>
    %39 = vector.shape_cast %38 : vector<4xf32> to vector<4x1xf32>
    %40 = arith.mulf %36, %34 : vector<4x32xf32>
    %cst_16 = arith.constant dense<0.000000e+00> : vector<4xf32>
    %41 = vector.multi_reduction <add>, %40, %cst_16 [1] : vector<4x32xf32> to vector<4xf32>
    %42 = vector.shape_cast %41 : vector<4xf32> to vector<4x1xf32>
    %c0_17 = arith.constant 0 : index
    %c0_18 = arith.constant 0 : index
    %43 = vector.load %arg5[%c0_17, %c0_18] : memref<32x128xf32, #tpu.memory_space<vmem>>, vector<32x128xf32>
    %cst_19 = arith.constant dense<0.000000e+00> : vector<4x128xf32>
    %44 = tpu.matmul %36, %43, %cst_19 {dimension_numbers = #tpu.dot_dimension_numbers<[1], [0], [0], [1], [0, 0, 1, 1], [], []>} : vector<4x32xf32>, vector<32x128xf32>, vector<4x128xf32> -> vector<4x128xf32>
    %45 = vector.extract_strided_slice %44 {offsets = [0, 0], sizes = [4, 64], strides = [1, 1]} : vector<4x128xf32> to vector<4x64xf32>
    %46 = vector.extract_strided_slice %44 {offsets = [0, 64], sizes = [4, 64], strides = [1, 1]} : vector<4x128xf32> to vector<4x64xf32>
    %cst_20 = arith.constant dense<0xFF800000> : vector<4xf32>
    %47 = vector.multi_reduction <maximumf>, %45, %cst_20 [1] : vector<4x64xf32> to vector<4xf32>
    %48 = vector.shape_cast %47 : vector<4xf32> to vector<4x1xf32>
    %49 = arith.maximumf %48, %39 : vector<4x1xf32>
    %50 = arith.subf %39, %49 : vector<4x1xf32>
    %51 = math.exp %50 : vector<4x1xf32>
    %52 = vector.broadcast %49 : vector<4x1xf32> to vector<4x64xf32>
    %53 = arith.subf %45, %52 : vector<4x64xf32>
    %54 = math.exp %53 : vector<4x64xf32>
    %cst_21 = arith.constant dense<0.000000e+00> : vector<4xf32>
    %55 = vector.multi_reduction <add>, %54, %cst_21 [1] : vector<4x64xf32> to vector<4xf32>
    %56 = vector.shape_cast %55 : vector<4xf32> to vector<4x1xf32>
    %57 = arith.addf %51, %56 : vector<4x1xf32>
    %58 = math.log %57 : vector<4x1xf32>
    %59 = arith.addf %49, %58 : vector<4x1xf32>
    %60 = arith.subf %39, %59 : vector<4x1xf32>
    %cst_22 = arith.constant dense<0.000000e+00> : vector<4xf32>
    %61 = vector.multi_reduction <add>, %45, %cst_22 [1] : vector<4x64xf32> to vector<4xf32>
    %62 = vector.shape_cast %61 : vector<4xf32> to vector<4x1xf32>
    %63 = arith.addf %39, %62 : vector<4x1xf32>
    %cst_23 = arith.constant 6.500000e+01 : f32
    %64 = vector.broadcast %cst_23 : f32 to vector<4x1xf32>
    %65 = arith.mulf %64, %59 : vector<4x1xf32>
    %66 = arith.subf %63, %65 : vector<4x1xf32>
    %cst_24 = arith.constant 0.899999976 : f32
    %67 = vector.broadcast %cst_24 : f32 to vector<4x1xf32>
    %68 = arith.mulf %67, %60 : vector<4x1xf32>
    %cst_25 = arith.constant 0.00153846154 : f32
    %69 = vector.broadcast %cst_25 : f32 to vector<4x1xf32>
    %70 = arith.mulf %69, %66 : vector<4x1xf32>
    %71 = arith.addf %68, %70 : vector<4x1xf32>
    %cst_26 = arith.constant 0.000000e+00 : f32
    %72 = vector.broadcast %cst_26 : f32 to vector<4x1xf32>
    %73 = arith.subf %72, %71 : vector<4x1xf32>
    %74 = vector.shape_cast %73 : vector<4x1xf32> to vector<1x4x1xf32>
    %cst_27 = arith.constant dense<0.000000e+00> : vector<1xf32>
    %75 = vector.multi_reduction <add>, %74, %cst_27 [1, 2] : vector<1x4x1xf32> to vector<1xf32>
    %76 = vector.shape_cast %75 : vector<1xf32> to vector<1x1x1xf32>
    %77 = vector.extract %76[0, 0, 0] : f32 from vector<1x1x1xf32>
    %cst_28 = arith.constant 4.000000e+00 : f32
    %78 = arith.divf %77, %cst_28 : f32
    %cst_29 = arith.constant dense<0xFF800000> : vector<4xf32>
    %79 = vector.multi_reduction <maximumf>, %46, %cst_29 [1] : vector<4x64xf32> to vector<4xf32>
    %80 = vector.shape_cast %79 : vector<4xf32> to vector<4x1xf32>
    %81 = arith.maximumf %80, %42 : vector<4x1xf32>
    %82 = arith.subf %42, %81 : vector<4x1xf32>
    %83 = math.exp %82 : vector<4x1xf32>
    %84 = vector.broadcast %81 : vector<4x1xf32> to vector<4x64xf32>
    %85 = arith.subf %46, %84 : vector<4x64xf32>
    %86 = math.exp %85 : vector<4x64xf32>
    %cst_30 = arith.constant dense<0.000000e+00> : vector<4xf32>
    %87 = vector.multi_reduction <add>, %86, %cst_30 [1] : vector<4x64xf32> to vector<4xf32>
    %88 = vector.shape_cast %87 : vector<4xf32> to vector<4x1xf32>
    %89 = arith.addf %83, %88 : vector<4x1xf32>
    %90 = math.log %89 : vector<4x1xf32>
    %91 = arith.addf %81, %90 : vector<4x1xf32>
    %92 = arith.subf %42, %91 : vector<4x1xf32>
    %cst_31 = arith.constant dense<0.000000e+00> : vector<4xf32>
    %93 = vector.multi_reduction <add>, %46, %cst_31 [1] : vector<4x64xf32> to vector<4xf32>
    %94 = vector.shape_cast %93 : vector<4xf32> to vector<4x1xf32>
    %95 = arith.addf %42, %94 : vector<4x1xf32>
    %cst_32 = arith.constant 6.500000e+01 : f32
    %96 = vector.broadcast %cst_32 : f32 to vector<4x1xf32>
    %97 = arith.mulf %96, %91 : vector<4x1xf32>
    %98 = arith.subf %95, %97 : vector<4x1xf32>
    %cst_33 = arith.constant 0.899999976 : f32
    %99 = vector.broadcast %cst_33 : f32 to vector<4x1xf32>
    %100 = arith.mulf %99, %92 : vector<4x1xf32>
    %cst_34 = arith.constant 0.00153846154 : f32
    %101 = vector.broadcast %cst_34 : f32 to vector<4x1xf32>
    %102 = arith.mulf %101, %98 : vector<4x1xf32>
    %103 = arith.addf %100, %102 : vector<4x1xf32>
    %cst_35 = arith.constant 0.000000e+00 : f32
    %104 = vector.broadcast %cst_35 : f32 to vector<4x1xf32>
    %105 = arith.subf %104, %103 : vector<4x1xf32>
    %106 = vector.shape_cast %105 : vector<4x1xf32> to vector<1x4x1xf32>
    %cst_36 = arith.constant dense<0.000000e+00> : vector<1xf32>
    %107 = vector.multi_reduction <add>, %106, %cst_36 [1, 2] : vector<1x4x1xf32> to vector<1xf32>
    %108 = vector.shape_cast %107 : vector<1xf32> to vector<1x1x1xf32>
    %109 = vector.extract %108[0, 0, 0] : f32 from vector<1x1x1xf32>
    %cst_37 = arith.constant 4.000000e+00 : f32
    %110 = arith.divf %109, %cst_37 : f32
    %111 = arith.subf %110, %78 : f32
    %cst_38 = arith.constant 0.000000e+00 : f32
    %112 = arith.subf %cst_38, %111 : f32
    %cst_39 = arith.constant 1.000000e+00 : f32
    %113 = arith.addf %112, %cst_39 : f32
    %cst_40 = arith.constant 0.000000e+00 : f32
    %114 = arith.maximumf %cst_40, %113 : f32
    %cst_41 = arith.constant 8.000000e-01 : f32
    %115 = arith.mulf %cst_41, %78 : f32
    %cst_42 = arith.constant 2.000000e-01 : f32
    %116 = arith.mulf %cst_42, %110 : f32
    %117 = arith.addf %115, %116 : f32
    %118 = arith.addf %117, %114 : f32
    %cst_43 = arith.constant 8.000000e-01 : f32
    %119 = vector.broadcast %cst_43 : f32 to vector<4x1xf32>
    %120 = arith.mulf %119, %39 : vector<4x1xf32>
    %cst_44 = arith.constant 2.000000e-01 : f32
    %121 = vector.broadcast %cst_44 : f32 to vector<4x1xf32>
    %122 = arith.mulf %121, %42 : vector<4x1xf32>
    %123 = arith.addf %120, %122 : vector<4x1xf32>
    %cst_45 = arith.constant 8.000000e-01 : f32
    %124 = vector.broadcast %cst_45 : f32 to vector<4x64xf32>
    %125 = arith.mulf %124, %45 : vector<4x64xf32>
    %cst_46 = arith.constant 2.000000e-01 : f32
    %126 = vector.broadcast %cst_46 : f32 to vector<4x64xf32>
    %127 = arith.mulf %126, %46 : vector<4x64xf32>
    %128 = arith.addf %125, %127 : vector<4x64xf32>
    %cst_47 = arith.constant dense<0xFF800000> : vector<4xf32>
    %129 = vector.multi_reduction <maximumf>, %128, %cst_47 [1] : vector<4x64xf32> to vector<4xf32>
    %130 = vector.shape_cast %129 : vector<4xf32> to vector<4x1xf32>
    %131 = arith.cmpf oge, %123, %130 : vector<4x1xf32>
    %132 = arith.extui %131 : vector<4x1xi1> to vector<4x1xi32>
    %133 = arith.sitofp %132 : vector<4x1xi32> to vector<4x1xf32>
    %134 = vector.shape_cast %133 : vector<4x1xf32> to vector<1x4x1xf32>
    %cst_48 = arith.constant dense<0.000000e+00> : vector<1xf32>
    %135 = vector.multi_reduction <add>, %134, %cst_48 [1, 2] : vector<1x4x1xf32> to vector<1xf32>
    %136 = vector.shape_cast %135 : vector<1xf32> to vector<1x1x1xf32>
    %137 = vector.extract %136[0, 0, 0] : f32 from vector<1x1x1xf32>
    %cst_49 = arith.constant 4.000000e+00 : f32
    %138 = arith.divf %137, %cst_49 : f32
    %cst_50 = arith.constant 1.000000e+02 : f32
    %139 = arith.mulf %cst_50, %138 : f32
    %c0_51 = arith.constant 0 : index
    %140 = memref.load %arg6[%c0_51] : memref<8xf32, #tpu.memory_space<smem>>
    memref.store %118, %arg6[%c0_51] : memref<8xf32, #tpu.memory_space<smem>>
    %c1 = arith.constant 1 : index
    %141 = memref.load %arg6[%c1] : memref<8xf32, #tpu.memory_space<smem>>
    memref.store %78, %arg6[%c1] : memref<8xf32, #tpu.memory_space<smem>>
    %c2 = arith.constant 2 : index
    %142 = memref.load %arg6[%c2] : memref<8xf32, #tpu.memory_space<smem>>
    memref.store %110, %arg6[%c2] : memref<8xf32, #tpu.memory_space<smem>>
    %c3 = arith.constant 3 : index
    %143 = memref.load %arg6[%c3] : memref<8xf32, #tpu.memory_space<smem>>
    memref.store %114, %arg6[%c3] : memref<8xf32, #tpu.memory_space<smem>>
    %c4 = arith.constant 4 : index
    %144 = memref.load %arg6[%c4] : memref<8xf32, #tpu.memory_space<smem>>
    memref.store %139, %arg6[%c4] : memref<8xf32, #tpu.memory_space<smem>>
    %cst_52 = arith.constant dense<0.000000e+00> : vector<32xf32>
    %145 = vector.multi_reduction <add>, %32, %cst_52 [0] : vector<4x32xf32> to vector<32xf32>
    %146 = vector.shape_cast %145 : vector<32xf32> to vector<1x32xf32>
    %cst_53 = arith.constant 4.000000e+00 : f32
    %147 = vector.broadcast %cst_53 : f32 to vector<1x32xf32>
    %148 = arith.divf %146, %147 : vector<1x32xf32>
    %149 = vector.broadcast %148 : vector<1x32xf32> to vector<4x32xf32>
    %150 = arith.subf %32, %149 : vector<4x32xf32>
    %151 = vector.broadcast %148 : vector<1x32xf32> to vector<4x32xf32>
    %152 = arith.subf %32, %151 : vector<4x32xf32>
    %153 = arith.mulf %150, %152 : vector<4x32xf32>
    %cst_54 = arith.constant dense<0.000000e+00> : vector<32xf32>
    %154 = vector.multi_reduction <add>, %153, %cst_54 [0] : vector<4x32xf32> to vector<32xf32>
    %155 = vector.shape_cast %154 : vector<32xf32> to vector<1x32xf32>
    %cst_55 = arith.constant 3.000000e+00 : f32
    %156 = vector.broadcast %cst_55 : f32 to vector<1x32xf32>
    %157 = arith.divf %155, %156 : vector<1x32xf32>
    %158 = math.sqrt %157 : vector<1x32xf32>
    %159 = vector.shape_cast %158 : vector<1x32xf32> to vector<1x1x32xf32>
    %cst_56 = arith.constant dense<0.000000e+00> : vector<1xf32>
    %160 = vector.multi_reduction <add>, %159, %cst_56 [1, 2] : vector<1x1x32xf32> to vector<1xf32>
    %161 = vector.shape_cast %160 : vector<1xf32> to vector<1x1x1xf32>
    %162 = vector.extract %161[0, 0, 0] : f32 from vector<1x1x1xf32>
    %cst_57 = arith.constant 3.200000e+01 : f32
    %163 = arith.divf %162, %cst_57 : f32
    %c5 = arith.constant 5 : index
    %164 = memref.load %arg6[%c5] : memref<8xf32, #tpu.memory_space<smem>>
    memref.store %163, %arg6[%c5] : memref<8xf32, #tpu.memory_space<smem>>
    %cst_58 = arith.constant dense<0.000000e+00> : vector<32xf32>
    %165 = vector.multi_reduction <add>, %33, %cst_58 [0] : vector<4x32xf32> to vector<32xf32>
    %166 = vector.shape_cast %165 : vector<32xf32> to vector<1x32xf32>
    %cst_59 = arith.constant 4.000000e+00 : f32
    %167 = vector.broadcast %cst_59 : f32 to vector<1x32xf32>
    %168 = arith.divf %166, %167 : vector<1x32xf32>
    %169 = vector.broadcast %168 : vector<1x32xf32> to vector<4x32xf32>
    %170 = arith.subf %33, %169 : vector<4x32xf32>
    %171 = vector.broadcast %168 : vector<1x32xf32> to vector<4x32xf32>
    %172 = arith.subf %33, %171 : vector<4x32xf32>
    %173 = arith.mulf %170, %172 : vector<4x32xf32>
    %cst_60 = arith.constant dense<0.000000e+00> : vector<32xf32>
    %174 = vector.multi_reduction <add>, %173, %cst_60 [0] : vector<4x32xf32> to vector<32xf32>
    %175 = vector.shape_cast %174 : vector<32xf32> to vector<1x32xf32>
    %cst_61 = arith.constant 3.000000e+00 : f32
    %176 = vector.broadcast %cst_61 : f32 to vector<1x32xf32>
    %177 = arith.divf %175, %176 : vector<1x32xf32>
    %178 = math.sqrt %177 : vector<1x32xf32>
    %179 = vector.shape_cast %178 : vector<1x32xf32> to vector<1x1x32xf32>
    %cst_62 = arith.constant dense<0.000000e+00> : vector<1xf32>
    %180 = vector.multi_reduction <add>, %179, %cst_62 [1, 2] : vector<1x1x32xf32> to vector<1xf32>
    %181 = vector.shape_cast %180 : vector<1xf32> to vector<1x1x1xf32>
    %182 = vector.extract %181[0, 0, 0] : f32 from vector<1x1x1xf32>
    %cst_63 = arith.constant 3.200000e+01 : f32
    %183 = arith.divf %182, %cst_63 : f32
    %c6 = arith.constant 6 : index
    %184 = memref.load %arg6[%c6] : memref<8xf32, #tpu.memory_space<smem>>
    memref.store %183, %arg6[%c6] : memref<8xf32, #tpu.memory_space<smem>>
    %cst_64 = arith.constant dense<0.000000e+00> : vector<32xf32>
    %185 = vector.multi_reduction <add>, %34, %cst_64 [0] : vector<4x32xf32> to vector<32xf32>
    %186 = vector.shape_cast %185 : vector<32xf32> to vector<1x32xf32>
    %cst_65 = arith.constant 4.000000e+00 : f32
    %187 = vector.broadcast %cst_65 : f32 to vector<1x32xf32>
    %188 = arith.divf %186, %187 : vector<1x32xf32>
    %189 = vector.broadcast %188 : vector<1x32xf32> to vector<4x32xf32>
    %190 = arith.subf %34, %189 : vector<4x32xf32>
    %191 = vector.broadcast %188 : vector<1x32xf32> to vector<4x32xf32>
    %192 = arith.subf %34, %191 : vector<4x32xf32>
    %193 = arith.mulf %190, %192 : vector<4x32xf32>
    %cst_66 = arith.constant dense<0.000000e+00> : vector<32xf32>
    %194 = vector.multi_reduction <add>, %193, %cst_66 [0] : vector<4x32xf32> to vector<32xf32>
    %195 = vector.shape_cast %194 : vector<32xf32> to vector<1x32xf32>
    %cst_67 = arith.constant 3.000000e+00 : f32
    %196 = vector.broadcast %cst_67 : f32 to vector<1x32xf32>
    %197 = arith.divf %195, %196 : vector<1x32xf32>
    %198 = math.sqrt %197 : vector<1x32xf32>
    %199 = vector.shape_cast %198 : vector<1x32xf32> to vector<1x1x32xf32>
    %cst_68 = arith.constant dense<0.000000e+00> : vector<1xf32>
    %200 = vector.multi_reduction <add>, %199, %cst_68 [1, 2] : vector<1x1x32xf32> to vector<1xf32>
    %201 = vector.shape_cast %200 : vector<1xf32> to vector<1x1x1xf32>
    %202 = vector.extract %201[0, 0, 0] : f32 from vector<1x1x1xf32>
    %cst_69 = arith.constant 3.200000e+01 : f32
    %203 = arith.divf %202, %cst_69 : f32
    %c7 = arith.constant 7 : index
    %204 = memref.load %arg6[%c7] : memref<8xf32, #tpu.memory_space<smem>>
    memref.store %203, %arg6[%c7] : memref<8xf32, #tpu.memory_space<smem>>
    return
  }
}

</mosaic_0001>

<bundles_post_ra>
// kernel: time_moco2_forward.1
= control target key start
LH: loop header
LB: loop body
LE: loop exit
PB: predicated region body
PF: predicated region fallthrough
CT: control target
= control target key end

     0   :  { %v28_v0 = vlaneseq  ;;  %s1237_s0 = inlined_call_operand.vmem [shape: s32[12,8], index: 0, kind: input, shape index: {}]   ;;  %s1238_s1 = inlined_call_operand.vmem [shape: f32[12,8], index: 1, kind: input, shape index: {}]   ;;  %s1239_s2 = inlined_call_operand.vmem [shape: f32[56,32], index: 2, kind: input, shape index: {}]   ;;  %s1240_s3 = inlined_call_operand.vmem [shape: f32[32,32], index: 3, kind: input, shape index: {}]   ;;  %s1241_s4 = inlined_call_operand.vmem [shape: f32[1,32], index: 4, kind: input, shape index: {}]   ;;  %s1242_s5 = inlined_call_operand.vmem [shape: f32[32,128], index: 5, kind: input, shape index: {}]   ;;  %s1243_s6 = inlined_call_operand.vmem [shape: f32[8], index: 6, kind: output, shape index: {}]  }
   0x1   :  { %11 = vsyncpa [#allocation3], 0  ;;  %v26_v2 = vld [vmem:[%s1238_s1] sm:$0xff]  ;;  %v25_v19 = vld [vmem:[%s1237_s0 + $0x8] sm:$0xf]  ;;  %vm394_vm0 = vcmask 64512  }
   0x2   :  { %v32_v1 = vshrl.u32 %v28_v0, 7  ;;  %v24_v3 = vld [vmem:[%s1237_s0] sm:$0xff]  ;;  %v150_v4 = vperm.slane %v26_v2, 0  ;;  %v157_v7 = vperm.slane %v26_v2, 1  ;;  %v164_v11 = vperm.slane %v26_v2, 2  ;;  %v337_v40 = vld [vmem:[%s1239_s2 + $0x30] sm:$0xff] }
   0x3   :  { %v44_v5 = vperm.slane %v24_v3, 2  ;;  %v30_v6 = vperm.slane %v24_v3, 0  ;;  %v51_v8 = vperm.slane %v24_v3, 3  ;;  %v37_v9 = vperm.slane %v24_v3, 1  ;;  %v1040_v23 = vld [vmem:[%s1238_s1 + $0x8] sm:$0xf]  ;;  %380 = vmatpush.msra.mxu0 %v337_v40  ;;  %905 = vmatpush.msra.mxu3 %v337_v40 }
   0x4   :  { %937 = vset.pattern.permute.xlu2 %v32_v1  ;;  %936 = vset.pattern.permute.xlu1 %v32_v1  ;;  %v65_v10 = vperm.slane %v24_v3, 5  ;;  %v58_v12 = vperm.slane %v24_v3, 4  ;;  %v178_v13 = vperm.slane %v26_v2, 4  ;;  %v72_v14 = vperm.slane %v24_v3, 6  ;;  %v336_v44 = vld [vmem:[%s1239_s2 + $0x28] sm:$0xff]  ;;  %v335_v48 = vld [vmem:[%s1239_s2 + $0x20] sm:$0xff] }
   0x5   :  { %935 = vset.pattern.permute.xlu0 %v32_v1  ;;  %v171_v15 = vperm.slane %v26_v2, 3  ;;  %v192_v16 = vperm.slane %v26_v2, 6  ;;  %v185_v17 = vperm.slane %v26_v2, 5  ;;  %v79_v18 = vperm.slane %v24_v3, 7  ;;  %381 = vmatpush.msra.mxu0 %v336_v44  ;;  %v334_v52 = vld [vmem:[%s1239_s2 + $0x18] sm:$0xff]  ;;  %v333_v55 = vld [vmem:[%s1239_s2 + $0x10] sm:$0xff] }
   0x6   :  { %v93_v20 = vperm.slane %v25_v19, 1  ;;  %v86_v21 = vperm.slane %v25_v19, 0  ;;  %v199_v22 = vperm.slane %v26_v2, 7  ;;  %v206_v24 = vperm.slane %v1040_v23, 0  ;;  %906 = vmatpush.msra.mxu3 %v336_v44  ;;  %v332_v60 = vld [vmem:[%s1239_s2 + $0x8] sm:$0xff]  ;;  %v331_v1 = vld [vmem:[%s1239_s2] sm:$0xff] }
   0x7   :  { %v107_v25 = vperm.slane %v25_v19, 3  ;;  %v100_v26 = vperm.slane %v25_v19, 2  ;;  %v220_v27 = vperm.slane %v1040_v23, 2  ;;  %v213_v28 = vperm.slane %v1040_v23, 1  ;;  %382 = vmatpush.msra.mxu0 %v335_v48  ;;  %s877_s11 = sshll.u32 %s1243_s6, 4  ;;  %s990_s25 = smov 0.0   ;;  %s878_s11 = int_to_ptr.vmem [resolvable:$true] %s877_s11 }
   0x8   :  { %v227_v29 = vperm.slane %v1040_v23, 3  ;;  %v395_v35 = vsel %vm394_vm0, %v26_v2, 0.0  ;;  %v1049_v36 = vand.u32 127, %v28_v0  ;;  %v985_v41 = vmov 0.0   ;;  %907 = vmatpush.msra.mxu3 %v335_v48  ;;  %s991_s0 = smov [#allocation2]  }
   0x9   :  { %vm246_vm4 = vcmask 457728   ;;  %383 = vmatpush.msra.mxu0 %v334_v52  ;;  %vm350_vm11 = vcmask 1041409   ;;  %vm352_vm12 = vcmask 1042434   ;;  %vm398_vm13 = vcmask 60416  }
   0xa   :  { %908 = vmatpush.msra.mxu3 %v334_v52  ;;  %vm354_vm14 = vcmask 1043459   ;;  %vm356_vm15 = vcmask 1044484  }
   0xb   :  { %384 = vmatpush.msra.mxu0 %v333_v55 }
   0xc   :  { %155 = vperm.xlu2 %937, %v150_v4   ;;  %49 = vperm.xlu1 %936, %v44_v5  }
   0xd   :  { %35 = vperm.xlu0 %935, %v30_v6   ;;  %909 = vmatpush.msra.mxu3 %v333_v55 }
   0xe   :  { %385 = vmatpush.msra.mxu0 %v332_v60 }
   0xf   :  { %910 = vmatpush.msra.mxu3 %v332_v60 }
  0x10   :  { %386 = vmatpush.msra.mxu0 %v331_v1 }
  0x11   :  { %911 = vmatpush.msra.mxu3 %v331_v1 }
  0x14   :  { %162 = vperm.xlu2 %937, %v157_v7   ;;  %56 = vperm.xlu1 %936, %v51_v8  }
  0x15   :  { %42 = vperm.xlu0 %935, %v37_v9  }
  0x1c   :  { %70 = vperm.xlu2 %937, %v65_v10   ;;  %169 = vperm.xlu1 %936, %v164_v11  }
  0x1d   :  { %63 = vperm.xlu0 %935, %v58_v12  }
  0x24   :  { %183 = vperm.xlu2 %937, %v178_v13   ;;  %77 = vperm.xlu1 %936, %v72_v14  }
  0x25   :  { %176 = vperm.xlu0 %935, %v171_v15  }
  0x2c   :  { %197 = vperm.xlu2 %937, %v192_v16   ;;  %190 = vperm.xlu1 %936, %v185_v17  }
  0x2d   :  { %84 = vperm.xlu0 %935, %v79_v18  }
  0x34   :  { %98 = vperm.xlu2 %937, %v93_v20   ;;  %91 = vperm.xlu1 %936, %v86_v21  }
  0x35   :  { %204 = vperm.xlu0 %935, %v199_v22  }
  0x3c   :  { %211 = vperm.xlu2 %937, %v206_v24   ;;  %112 = vperm.xlu1 %936, %v107_v25  }
  0x3d   :  { %105 = vperm.xlu0 %935, %v100_v26  }
  0x44   :  { %225 = vperm.xlu2 %937, %v220_v27  }
  0x45   :  { %218 = vperm.xlu0 %935, %v213_v28  }
  0x4d   :  { %232 = vperm.xlu0 %935, %v227_v29  }
  0x66   :  { %v156_v30 = vpop.permute.xlu2 %155  ;;  %396 = vadd.xlane.f32.xlu1 %v395_v35 }
  0x6e   :  { %v163_v31 = vpop.permute.xlu2 %162 }
  0x76   :  { %v1046_v33 = vpop.permute.xlu2 %70 }
  0x77   :  { %vm119_vm8 = vcmp.eq.s32.totalorder %v1046_v33, %v1049_v36 }
  0x78   :  { %v892_v20 = vsel %vm119_vm8, 1.0, %v985_v41 }
  0x7e   :  { %v50_v32 = vpop.permute.xlu1 %49  ;;  %v184_v39 = vpop.permute.xlu2 %183 }
  0x7f   :  { %v36_v34 = vpop.permute.xlu0 %35  ;;  %vm116_vm3 = vcmp.eq.s32.totalorder %v50_v32, %v1049_v36 }
  0x80   :  { %vm114_vm2 = vcmp.eq.s32.totalorder %v36_v34, %v1049_v36  ;;  %v889_v46 = vsel %vm116_vm3, 1.0, %v985_v41 }
  0x81   :  { %v887_v43 = vsel %vm114_vm2, 1.0, %v985_v41  ;;  %vm360_vm2 = vcmask 1046534  }
  0x82   :  { %v234_v49 = vmul.f32 %v887_v43, %v156_v30 }
  0x84   :  { %v247_v56 = vsel %vm246_vm4, %v234_v49, 0.0 }
  0x85   :  { %v248_v62 = vrot.slane %v247_v56, 4 }
  0x86   :  { %v57_v37 = vpop.permute.xlu1 %56  ;;  %v198_v57 = vpop.permute.xlu2 %197 }
  0x87   :  { %v43_v38 = vpop.permute.xlu0 %42  ;;  %vm117_vm6 = vcmp.eq.s32.totalorder %v57_v37, %v1049_v36  ;;  %v249_v9 = vadd.f32 %v248_v62, %v247_v56  ;;  %v399_v62 = vsel %vm398_vm13, %v1040_v23, 0.0 }
  0x88   :  { %vm115_vm1 = vcmp.eq.s32.totalorder %v43_v38, %v1049_v36  ;;  %v890_v2 = vsel %vm117_vm6, 1.0, %v985_v41  ;;  %400 = vadd.xlane.f32.xlu2 %v399_v62 }
  0x89   :  { %v888_v42 = vsel %vm115_vm1, 1.0, %v985_v41  ;;  %v250_v18 = vrot.slane %v249_v9, 2  ;;  %vm358_vm1 = vcmask 1045509  }
  0x8a   :  { %v235_v45 = vmul.f32 %v888_v42, %v163_v31 }
  0x8b   :  { %v251_v30 = vadd.f32 %v250_v18, %v249_v9 }
  0x8c   :  { %v254_v54 = vsel %vm246_vm4, %v235_v45, 0.0 }
  0x8d   :  { %v255_v61 = vrot.slane %v254_v54, 4 }
  0x8e   :  { %v170_v47 = vpop.permute.xlu1 %169  ;;  %v1091_v15 = vpop.permute.xlu2 %98 }
  0x8f   :  { %v236_v50 = vmul.f32 %v889_v46, %v170_v47  ;;  %v64_v51 = vpop.permute.xlu0 %63  ;;  %v256_v7 = vadd.f32 %v255_v61, %v254_v54  ;;  %vm123_vm3 = vcmp.eq.s32.totalorder %v1091_v15, %v1049_v36 }
  0x90   :  { %vm118_vm5 = vcmp.eq.s32.totalorder %v64_v51, %v1049_v36 }
  0x91   :  { %v891_v53 = vsel %vm118_vm5, 1.0, %v985_v41  ;;  %v261_v58 = vsel %vm246_vm4, %v236_v50, 0.0  ;;  %v257_v14 = vrot.slane %v256_v7, 2  ;;  %vm362_vm5 = vcmask 1047559  }
  0x92   :  { %v238_v59 = vmul.f32 %v891_v53, %v184_v39  ;;  %v262_v63 = vrot.slane %v261_v58, 4  ;;  %v252_v39 = vrot.slane %v251_v30, 1 }
  0x93   :  { %v258_v28 = vadd.f32 %v257_v14, %v256_v7 }
  0x94   :  { %v275_v4 = vsel %vm246_vm4, %v238_v59, 0.0  ;;  %v263_v10 = vadd.f32 %v262_v63, %v261_v58  ;;  %v253_v53 = vadd.f32 %v252_v39, %v251_v30 }
  0x95   :  { %v276_v12 = vrot.slane %v275_v4, 4  ;;  %v259_v38 = vrot.slane %v258_v28, 1 }
  0x96   :  { %v78_v0 = vpop.permute.xlu1 %77  ;;  %v264_v19 = vrot.slane %v263_v10, 2  ;;  %v212_v46 = vpop.permute.xlu2 %211 }
  0x97   :  { %vm120_vm7 = vcmp.eq.s32.totalorder %v78_v0, %v1049_v36  ;;  %v177_v3 = vpop.permute.xlu0 %176  ;;  %v277_v22 = vadd.f32 %v276_v12, %v275_v4  ;;  %v260_v52 = vadd.f32 %v259_v38, %v258_v28 }
  0x98   :  { %v893_v5 = vsel %vm120_vm7, 1.0, %v985_v41  ;;  %v237_v6 = vmul.f32 %v890_v2, %v177_v3  ;;  %v265_v31 = vadd.f32 %v264_v19, %v263_v10 }
  0x99   :  { %v240_v8 = vmul.f32 %v893_v5, %v198_v57  ;;  %v278_v34 = vrot.slane %v277_v22, 2  ;;  %v351_v63 = vsel %vm350_vm11, %v260_v52, %v253_v53 }
  0x9a   :  { %v268_v11 = vsel %vm246_vm4, %v237_v6, 0.0  ;;  %v266_v40 = vrot.slane %v265_v31, 1 }
  0x9b   :  { %v269_v13 = vrot.slane %v268_v11, 4  ;;  %v289_v16 = vsel %vm246_vm4, %v240_v8, 0.0  ;;  %v279_v45 = vadd.f32 %v278_v34, %v277_v22  ;;  %v896_v22 = vsel %vm123_vm3, 1.0, %v985_v41 }
  0x9c   :  { %v290_v27 = vrot.slane %v289_v16, 4  ;;  %v267_v54 = vadd.f32 %v266_v40, %v265_v31 }
  0x9d   :  { %v270_v17 = vadd.f32 %v269_v13, %v268_v11  ;;  %v280_v60 = vrot.slane %v279_v45, 1 }
  0x9e   :  { %v191_v21 = vpop.permute.xlu1 %190  ;;  %v291_v35 = vadd.f32 %v290_v27, %v289_v16  ;;  %v353_v1 = vsel %vm352_vm12, %v267_v54, %v351_v63  ;;  %v226_v9 = vpop.permute.xlu2 %225  ;;  %v432_v63 = vld [vmem:[%s1240_s3] sm:$0xff] }
  0x9f   :  { %v271_v24 = vrot.slane %v270_v17, 2  ;;  %v239_v25 = vmul.f32 %v892_v20, %v191_v21  ;;  %v85_v26 = vpop.permute.xlu0 %84  ;;  %v281_v7 = vadd.f32 %v280_v60, %v279_v45  ;;  %v434_v60 = vld [vmem:[%s1240_s3 + $0x10] sm:$0xff] }
  0xa0   :  { %vm121_vm9 = vcmp.eq.s32.totalorder %v85_v26, %v1049_v36  ;;  %v292_v49 = vrot.slane %v291_v35, 2 }
  0xa1   :  { %v282_v29 = vsel %vm246_vm4, %v239_v25, 0.0  ;;  %v272_v32 = vadd.f32 %v271_v24, %v270_v17  ;;  %v894_v47 = vsel %vm121_vm9, 1.0, %v985_v41 }
  0xa2   :  { %v283_v33 = vrot.slane %v282_v29, 4  ;;  %v293_v61 = vadd.f32 %v292_v49, %v291_v35 }
  0xa3   :  { %v273_v42 = vrot.slane %v272_v32, 1 }
  0xa4   :  { %v284_v37 = vadd.f32 %v283_v33, %v282_v29  ;;  %v294_v8 = vrot.slane %v293_v61, 1 }
  0xa5   :  { %v274_v55 = vadd.f32 %v273_v42, %v272_v32 }
  0xa6   :  { %v285_v43 = vrot.slane %v284_v37, 2  ;;  %v92_v44 = vpop.permute.xlu1 %91  ;;  %v295_v17 = vadd.f32 %v294_v8, %v293_v61  ;;  %v433_v61 = vld [vmem:[%s1240_s3 + $0x8] sm:$0xff] }
  0xa7   :  { %v205_v48 = vpop.permute.xlu0 %204  ;;  %vm122_vm10 = vcmp.eq.s32.totalorder %v92_v44, %v1049_v36  ;;  %v355_v6 = vsel %vm354_vm14, %v274_v55, %v353_v1 }
  0xa8   :  { %v286_v50 = vadd.f32 %v285_v43, %v284_v37  ;;  %v241_v51 = vmul.f32 %v894_v47, %v205_v48  ;;  %v895_v58 = vsel %vm122_vm10, 1.0, %v985_v41  ;;  %v357_v13 = vsel %vm356_vm15, %v281_v7, %v355_v6 }
  0xa9   :  { %v242_v2 = vmul.f32 %v895_v58, %v212_v46  ;;  %vm440_vm10 = vcmask 261120   ;;  %vm475_vm15 = vcmask 257024  }
  0xaa   :  { %v296_v56 = vsel %vm246_vm4, %v241_v51, 0.0  ;;  %v287_v57 = vrot.slane %v286_v50, 1 }
  0xab   :  { %v297_v59 = vrot.slane %v296_v56, 4  ;;  %v303_v11 = vsel %vm246_vm4, %v242_v2, 0.0 }
  0xac   :  { %v288_v3 = vadd.f32 %v287_v57, %v286_v50  ;;  %v304_v18 = vrot.slane %v303_v11, 4 }
  0xad   :  { %v298_v0 = vadd.f32 %v297_v59, %v296_v56  ;;  %v435_v59 = vld [vmem:[%s1240_s3 + $0x18] sm:$0xff] }
  0xae   :  { %v359_v16 = vsel %vm358_vm1, %v288_v3, %v357_v13  ;;  %v305_v28 = vadd.f32 %v304_v18, %v303_v11  ;;  %v113_v29 = vpop.permute.xlu1 %112  ;;  %459 = vmatpush.msra.mxu1 %v435_v59 }
  0xaf   :  { %v299_v4 = vrot.slane %v298_v0, 2  ;;  %v106_v5 = vpop.permute.xlu0 %105  ;;  %v361_v21 = vsel %vm360_vm2, %v295_v17, %v359_v16  ;;  %vm125_vm6 = vcmp.eq.s32.totalorder %v113_v29, %v1049_v36 }
  0xb0   :  { %vm124_vm0 = vcmp.eq.s32.totalorder %v106_v5, %v1049_v36  ;;  %v306_v32 = vrot.slane %v305_v28, 2  ;;  %v898_v35 = vsel %vm125_vm6, 1.0, %v985_v41  ;;  %460 = vmatpush.msra.mxu1 %v434_v60 }
  0xb1   :  { %v300_v23 = vadd.f32 %v299_v4, %v298_v0  ;;  %v897_v10 = vsel %vm124_vm0, 1.0, %v985_v41 }
  0xb2   :  { %v244_v12 = vmul.f32 %v897_v10, %v226_v9  ;;  %v307_v40 = vadd.f32 %v306_v32, %v305_v28  ;;  %461 = vmatpush.msra.mxu1 %v433_v61 }
  0xb3   :  { %v301_v14 = vrot.slane %v300_v23, 1 }
  0xb4   :  { %v317_v19 = vsel %vm246_vm4, %v244_v12, 0.0  ;;  %v308_v47 = vrot.slane %v307_v40, 1  ;;  %462 = vmatpush.msra.mxu1 %v432_v63 }
  0xb5   :  { %v302_v20 = vadd.f32 %v301_v14, %v300_v23  ;;  %v318_v26 = vrot.slane %v317_v19, 4 }
  0xb6   :  { %v309_v51 = vadd.f32 %v308_v47, %v307_v40 }
  0xb7   :  { %v219_v24 = vpop.permute.xlu0 %218  ;;  %v363_v25 = vsel %vm362_vm5, %v302_v20, %v361_v21  ;;  %v319_v31 = vadd.f32 %v318_v26, %v317_v19  ;;  %v938_v26 = vld [vmem:[%s1241_s4] ss:$0 sm:$0xff] }
  0xb8   :  { %v243_v27 = vmul.f32 %v896_v22, %v219_v24  ;;  %899 = vmatmul.msk.f32.vlgmr.msra.gmra.mxu0 %vm246_vm4, %v363_v25 }
  0xb9   :  { %v320_v38 = vrot.slane %v319_v31, 2 }
  0xba   :  { %v310_v30 = vsel %vm246_vm4, %v243_v27, 0.0 }
  0xbb   :  { %v311_v15 = vrot.slane %v310_v30, 4  ;;  %v321_v46 = vadd.f32 %v320_v38, %v319_v31  ;;  %v515_v38 = vld [vmem:[%s1242_s5] sm:$0xff] }
  0xbd   :  { %v312_v33 = vadd.f32 %v311_v15, %v310_v30  ;;  %v322_v50 = vrot.slane %v321_v46, 1 }
  0xbf   :  { %v313_v34 = vrot.slane %v312_v33, 2  ;;  %v233_v37 = vpop.permute.xlu0 %232  ;;  %v323_v55 = vadd.f32 %v322_v50, %v321_v46 }
  0xc0   :  { %v245_v39 = vmul.f32 %v898_v35, %v233_v37  ;;  %v517_v35 = vld [vmem:[%s1242_s5 + $0x10] sm:$0xff]  ;;  %v516_v37 = vld [vmem:[%s1242_s5 + $0x8] sm:$0xff] }
  0xc1   :  { %v314_v42 = vadd.f32 %v313_v34, %v312_v33  ;;  %v518_v34 = vld [vmem:[%s1242_s5 + $0x18] sm:$0xff]  ;;  %s988_s5 = smov 64  }
  0xc2   :  { %v324_v43 = vsel %vm246_vm4, %v245_v39, 0.0  ;;  %534 = vmatpush.msra.mxu2 %v518_v34 }
  0xc3   :  { %v315_v44 = vrot.slane %v314_v42, 1  ;;  %v325_v45 = vrot.slane %v324_v43, 4 }
  0xc4   :  { %535 = vmatpush.msra.mxu2 %v517_v35 }
  0xc5   :  { %v326_v48 = vadd.f32 %v325_v45, %v324_v43  ;;  %v316_v49 = vadd.f32 %v315_v44, %v314_v42  ;;  %v986_v45 = vmov 4.0  }
  0xc6   :  { %536 = vmatpush.msra.mxu2 %v516_v37 }
  0xc7   :  { %v327_v36 = vrot.slane %v326_v48, 2  ;;  %v364_v54 = vsel %vm350_vm11, %v316_v49, %v309_v51 }
  0xc8   :  { %v365_v57 = vsel %vm352_vm12, %v323_v55, %v364_v54  ;;  %537 = vmatpush.msra.mxu2 %v515_v38 }
  0xc9   :  { %v328_v52 = vadd.f32 %v327_v36, %v326_v48 }
  0xcb   :  { %v329_v53 = vrot.slane %v328_v52, 1 }
  0xcd   :  { %v330_v56 = vadd.f32 %v329_v53, %v328_v52 }
  0xcf   :  { %v366_v58 = vsel %vm354_vm14, %v330_v56, %v365_v57 }
  0xd0   :  { %900 = vmatmul.msk.f32.vlgmr.msra.gmra.mxu3 %vm246_vm4, %v366_v58 }
  0xd9   :  { %v397_v62 = vpop.xlane.xlu1 %396 }
  0xda   :  { %939 = vrcp.f32 %v397_v62  ;;  %vm407_vm4 = vweird.f32 %v397_v62  ;;  %v413_v4 = vand.u32 2147483648, %v397_v62  ;;  %v411_v6 = vand.u32 2147483647, %v397_v62 }
  0xdc   :  { %v414_v7 = vor.u32 1.1754944e-38, %v413_v4  ;;  %vm412_vm9 = vcmp.eq.f32.partialorder %v411_v6, 8.507059e+37 }
  0xe0   :  { %v940_v0 = vpop.eup %939 }
  0xe1   :  { %v403_v1 = vmul.f32 %v940_v0, %v397_v62  ;;  %vm408_vm7 = vweird.f32 %v940_v0  ;;  %v987_v62 = vmov 3.0  }
  0xe2   :  { %vm409_vm8 = vmor %vm407_vm4, %vm408_vm7 }
  0xe3   :  { %v404_v2 = vsub.f32 1.0, %v403_v1 }
  0xe5   :  { %v405_v3 = vmul.f32 %v940_v0, %v404_v2 }
  0xe7   :  { %v406_v5 = vadd.f32 %v940_v0, %v405_v3 }
  0xe9   :  { %v410_v8 = vsel %vm409_vm8, %v940_v0, %v406_v5 }
  0xea   :  { %v415_v10 = vsel %vm412_vm9, %v414_v7, %v410_v8 }
  0xfb   :  { %v401_v9 = vpop.xlane.xlu2 %400 }
  0xfc   :  { %941 = vrcp.f32 %v401_v9  ;;  %vm421_vm11 = vweird.f32 %v401_v9  ;;  %v427_v17 = vand.u32 2147483648, %v401_v9  ;;  %v425_v19 = vand.u32 2147483647, %v401_v9 }
  0xfe   :  { %v428_v20 = vor.u32 1.1754944e-38, %v427_v17  ;;  %vm426_vm14 = vcmp.eq.f32.partialorder %v425_v19, 8.507059e+37 }
 0x102   :  { %v942_v12 = vpop.eup %941 }
 0x103   :  { %v417_v13 = vmul.f32 %v942_v12, %v401_v9  ;;  %vm422_vm12 = vweird.f32 %v942_v12 }
 0x104   :  { %vm423_vm13 = vmor %vm421_vm11, %vm422_vm12  ;;  %vm591_vm11 = vcmask 1043968   ;;  %vm542_vm12 = vcmask 519168  }
 0x105   :  { %v418_v14 = vsub.f32 1.0, %v417_v13 }
 0x107   :  { %v419_v16 = vmul.f32 %v942_v12, %v418_v14 }
 0x109   :  { %v420_v18 = vadd.f32 %v942_v12, %v419_v16 }
 0x10b   :  { %v424_v21 = vsel %vm423_vm13, %v942_v12, %v420_v18  ;;  %vm571_vm13 = vcmask 3072  }
 0x10c   :  { %v429_v22 = vsel %vm426_vm14, %v428_v20, %v424_v21 }
 0x135   :  { %v388_v23 = vpop.f32.mrf.mxu0 }
 0x136   :  { %v430_v11 = vmul.f32 %v415_v10, %v388_v23 }
 0x138   :  { %901 = vmatmul.msk.f32.vlgmr.msra.gmra.mxu1 %vm440_vm10, %v430_v11 }
 0x153   :  { %v391_v24 = vpop.f32.mrf.mxu3 }
 0x154   :  { %v431_v25 = vmul.f32 %v429_v22, %v391_v24 }
 0x156   :  { %902 = vmatmul.msk.f32.gmra.mxu1 %vm440_vm10, %v431_v25 }
 0x1b5   :  { %v464_v27 = vpop.f32.mrf.mxu1 }
 0x1b6   :  { %v465_v28 = vadd.f32 %v938_v26, %v464_v27 }
 0x1b8   :  { %v470_v29 = vmul.f32 %v465_v28, %v465_v28 }
 0x1ba   :  { %v472_v30 = vsel %vm440_vm10, %v470_v29, 0.0 }
 0x1bb   :  { %473 = vadd.xlane.f32.xlu0 %v472_v30 }
 0x1d3   :  { %v467_v15 = vpop.f32.mrf.mxu1 }
 0x1d4   :  { %v1139_v31 = vadd.f32 %v938_v26, %v467_v15 }
 0x1d6   :  { %v471_v32 = vmul.f32 %v1139_v31, %v1139_v31 }
 0x1d8   :  { %v476_v33 = vsel %vm475_vm15, %v471_v32, 0.0 }
 0x1d9   :  { %477 = vadd.xlane.f32.xlu1 %v476_v33 }
 0x22e   :  { %v474_v39 = vpop.xlane.xlu0 %473 }
 0x22f   :  { %v479_v40 = vmax.f32 %v474_v39, 1e-24 }
 0x231   :  { %943 = vrsqrt.f32 %v479_v40  ;;  %vm487_vm1 = vweird.f32 %v479_v40 }
 0x232   :  { %945 = vrcp.f32 %v986_v45 }
 0x233   :  { %947 = vrcp.f32 %v987_v62 }
 0x237   :  { %v944_v42 = vpop.eup %943 }
 0x238   :  { %v482_v43 = vmul.f32 %v944_v42, %v479_v40  ;;  %vm488_vm0 = vweird.f32 %v944_v42  ;;  %v946_v48 = vpop.eup %945 }
 0x239   :  { %vm489_vm2 = vmor %vm487_vm1, %vm488_vm0  ;;  %v583_v51 = vmul.f32 4.0, %v946_v48  ;;  %vm587_vm3 = vweird.f32 %v946_v48  ;;  %v948_v4 = vpop.eup %947 }
 0x23a   :  { %v483_v44 = vmul.f32 %v944_v42, %v482_v43  ;;  %v726_v23 = vmul.f32 3.0, %v948_v4  ;;  %vm730_vm7 = vweird.f32 %v948_v4 }
 0x23b   :  { %v584_v54 = vsub.f32 1.0, %v583_v51 }
 0x23c   :  { %v484_v46 = vmul.f32 0.5, %v483_v44  ;;  %v727_v14 = vsub.f32 1.0, %v726_v23 }
 0x23d   :  { %v585_v58 = vmul.f32 %v946_v48, %v584_v54 }
 0x23e   :  { %v485_v47 = vsub.f32 1.5, %v484_v46  ;;  %v728_v21 = vmul.f32 %v948_v4, %v727_v14 }
 0x23f   :  { %v586_v0 = vadd.f32 %v946_v48, %v585_v58 }
 0x240   :  { %v486_v49 = vmul.f32 %v944_v42, %v485_v47  ;;  %v729_v27 = vadd.f32 %v948_v4, %v728_v21 }
 0x241   :  { %v1162_v3 = vsel %vm587_vm3, %v946_v48, %v586_v0 }
 0x242   :  { %v490_v36 = vsel %vm489_vm2, %v944_v42, %v486_v49  ;;  %v1172_v15 = vsel %vm730_vm7, %v948_v4, %v729_v27 }
 0x243   :  { %v1156_v50 = vmul.f32 %v490_v36, %v465_v28 }
 0x245   :  { %v503_v52 = vmul.f32 20.0, %v1156_v50  ;;  %v505_v53 = vrot.slane %v1156_v50, 4  ;;  %v701_v4 = vsel %vm475_vm15, %v1156_v50, 0.0 }
 0x247   :  { %903 = vmatmul.msk.f32.vlgmr.msra.gmra.mxu2 %vm440_vm10, %v503_v52  ;;  %v767_v55 = vsel %vm475_vm15, %v505_v53, 0.0  ;;  %v507_v32 = vmul.f32 %v505_v53, %v503_v52  ;;  %vm745_vm10 = vcmask 253952  }
 0x248   :  { %v768_v56 = vrot.slane %v767_v55, 4 }
 0x24a   :  { %v769_v57 = vadd.f32 %v768_v56, %v767_v55 }
 0x24c   :  { %v478_v59 = vpop.xlane.xlu1 %477  ;;  %v770_v60 = vrot.slane %v769_v57, 2 }
 0x24d   :  { %v480_v61 = vmax.f32 %v478_v59, 1e-24 }
 0x24e   :  { %v771_v63 = vadd.f32 %v770_v60, %v769_v57 }
 0x24f   :  { %949 = vrsqrt.f32 %v480_v61  ;;  %vm497_vm6 = vweird.f32 %v480_v61 }
 0x250   :  { %v772_v1 = vrot.slane %v771_v63, 1 }
 0x252   :  { %v773_v2 = vadd.f32 %v772_v1, %v771_v63 }
 0x254   :  { %v774_v5 = vmul.f32 %v773_v2, %v1162_v3 }
 0x255   :  { %v950_v6 = vpop.eup %949 }
 0x256   :  { %v492_v7 = vmul.f32 %v950_v6, %v480_v61  ;;  %v775_v8 = vsub.f32 %v1156_v50, %v774_v5  ;;  %vm498_vm5 = vweird.f32 %v950_v6  ;;  %v702_v5 = vrot.slane %v701_v4, 4 }
 0x257   :  { %vm499_vm4 = vmor %vm497_vm6, %vm498_vm5 }
 0x258   :  { %v493_v9 = vmul.f32 %v950_v6, %v492_v7  ;;  %v776_v10 = vmul.f32 %v775_v8, %v775_v8 }
 0x25a   :  { %v494_v11 = vmul.f32 0.5, %v493_v9  ;;  %v778_v12 = vrot.slane %v776_v10, 4 }
 0x25c   :  { %v495_v13 = vsub.f32 1.5, %v494_v11  ;;  %v780_v16 = vsel %vm475_vm15, %v778_v12, 0.0 }
 0x25d   :  { %v781_v17 = vrot.slane %v780_v16, 4 }
 0x25e   :  { %v496_v18 = vmul.f32 %v950_v6, %v495_v13 }
 0x25f   :  { %v782_v19 = vadd.f32 %v781_v17, %v780_v16 }
 0x260   :  { %v500_v20 = vsel %vm499_vm4, %v950_v6, %v496_v18  ;;  %v703_v6 = vadd.f32 %v702_v5, %v701_v4 }
 0x261   :  { %v1168_v22 = vmul.f32 %v500_v20, %v1139_v31  ;;  %v783_v24 = vrot.slane %v782_v19, 2  ;;  %v508_v31 = vsel %vm475_vm15, %v507_v32, 0.0 }
 0x262   :  { %v704_v7 = vrot.slane %v703_v6, 2 }
 0x263   :  { %v511_v25 = vmul.f32 %v503_v52, %v1168_v22  ;;  %v784_v26 = vadd.f32 %v783_v24, %v782_v19 }
 0x264   :  { %v705_v8 = vadd.f32 %v704_v7, %v703_v6 }
 0x265   :  { %v512_v28 = vsel %vm475_vm15, %v511_v25, 0.0  ;;  %v785_v29 = vrot.slane %v784_v26, 1 }
 0x266   :  { %513 = vadd.xlane.f32.xlu2 %v512_v28  ;;  %v706_v9 = vrot.slane %v705_v8, 1 }
 0x267   :  { %v786_v30 = vadd.f32 %v785_v29, %v784_v26 }
 0x268   :  { %v707_v23 = vadd.f32 %v706_v9, %v705_v8 }
 0x269   :  { %v787_v33 = vmul.f32 %v786_v30, %v1172_v15 }
 0x26a   :  { %v715_v10 = vmul.f32 %v707_v23, %v1162_v3 }
 0x26b   :  { %951 = vrsqrt.f32 %v787_v33  ;;  %vm795_vm8 = vcmp.eq.f32.partialorder %v787_v33, inf  ;;  %v798_v43 = vand.u32 2147483648, %v787_v33  ;;  %vm797_vm9 = vcmp.eq.f32.partialorder %v787_v33, 0.0 }
 0x26c   :  { %v716_v11 = vsub.f32 %v1156_v50, %v715_v10  ;;  %v821_v50 = vsel %vm475_vm15, %v1168_v22, 0.0 }
 0x26d   :  { %v822_v30 = vrot.slane %v821_v50, 4 }
 0x26e   :  { %509 = vadd.xlane.f32.xlu2 %v508_v31  ;;  %v717_v13 = vmul.f32 %v716_v11, %v716_v11 }
 0x26f   :  { %v823_v31 = vadd.f32 %v822_v30, %v821_v50 }
 0x270   :  { %v718_v18 = vsel %vm475_vm15, %v717_v13, 0.0 }
 0x271   :  { %v952_v34 = vpop.eup %951  ;;  %v719_v20 = vrot.slane %v718_v18, 4 }
 0x272   :  { %v789_v35 = vmul.f32 %v952_v34, %v787_v33 }
 0x273   :  { %v720_v24 = vadd.f32 %v719_v20, %v718_v18 }
 0x274   :  { %v790_v37 = vmul.f32 %v952_v34, %v789_v35 }
 0x275   :  { %v721_v25 = vrot.slane %v720_v24, 2 }
 0x276   :  { %v791_v38 = vmul.f32 0.5, %v790_v37 }
 0x277   :  { %v722_v26 = vadd.f32 %v721_v25, %v720_v24 }
 0x278   :  { %v792_v39 = vsub.f32 1.5, %v791_v38 }
 0x279   :  { %v723_v27 = vrot.slane %v722_v26, 1 }
 0x27a   :  { %v793_v40 = vmul.f32 %v952_v34, %v792_v39  ;;  %v824_v34 = vrot.slane %v823_v31, 2 }
 0x27b   :  { %v724_v28 = vadd.f32 %v723_v27, %v722_v26 }
 0x27c   :  { %v794_v42 = vmul.f32 %v793_v40, %v787_v33  ;;  %v825_v37 = vadd.f32 %v824_v34, %v823_v31 }
 0x27d   :  { %v732_v32 = vmul.f32 %v1172_v15, %v724_v28 }
 0x27e   :  { %v796_v44 = vsel %vm795_vm8, %v787_v33, %v794_v42 }
 0x27f   :  { %v799_v45 = vsel %vm797_vm9, %v798_v43, %v796_v44  ;;  %v826_v43 = vrot.slane %v825_v37, 1  ;;  %vm740_vm14 = vcmp.eq.f32.partialorder %v732_v32, inf  ;;  %v743_v23 = vand.u32 2147483648, %v732_v32 }
 0x280   :  { %v1177_v46 = vsel %vm745_vm10, %v799_v45, 0.0  ;;  %vm742_vm0 = vcmp.eq.f32.partialorder %v732_v32, 0.0 }
 0x281   :  { %v827_v45 = vadd.f32 %v826_v43, %v825_v37 }
 0x2ca   :  { %v539_v47 = vpop.f32.mrf.mxu2 }
 0x2cb   :  { %615 = vrot.lane.b32.xlu2 %v539_v47, %s988_s5  ;;  %v592_v48 = vsel %vm591_vm11, %v539_v47, -inf  ;;  %v543_v49 = vsel %vm542_vm12, %v539_v47, -inf  ;;  %v659_v36 = vmul.f32 0.2, %v539_v47  ;;  %v561_v51 = vsel %vm542_vm12, %v539_v47, 0.0 }
 0x2cc   :  { %593 = vmax.xlane.f32.xlu1 %v592_v48  ;;  %544 = vmax.xlane.f32.xlu0 %v543_v49  ;;  %v658_v17 = vmul.f32 0.8, %v539_v47 }
 0x2d9   :  { %v1181_v52 = vpop.xlane.xlu2 %513 }
 0x2da   :  { %v656_v30 = vmul.f32 0.2, %v1181_v52 }
 0x2e0   :  { %661 = vrot.lane.b32.xlu0 %v659_v36, %s988_s5  ;;  %v828_v36 = vmul.f32 %v827_v45, %v1162_v3 }
 0x2e1   :  { %v1187_v59 = vpop.xlane.xlu2 %509 }
 0x2f4   :  { %562 = vadd.xlane.f32.xlu2 %v561_v51 }
 0x325   :  { %v616_v1 = vpop.permute.xlu2 %615 }
 0x326   :  { %v618_v2 = vsel %vm542_vm12, %v616_v1, 0.0 }
 0x33f   :  { %v594_v53 = vpop.xlane.xlu1 %593  ;;  %v545_v58 = vpop.xlane.xlu0 %544 }
 0x340   :  { %v1184_v54 = vmax.f32 %v594_v53, %v1181_v52  ;;  %v546_v60 = vmax.f32 %v545_v58, %v1187_v59 }
 0x342   :  { %v599_v55 = vsub.f32 %v539_v47, %v1184_v54  ;;  %v550_v61 = vsub.f32 %v539_v47, %v546_v60  ;;  %v547_v29 = vsub.f32 %v1187_v59, %v546_v60 }
 0x344   :  { %v600_v56 = vmul.f32 1.442695, %v599_v55  ;;  %v551_v62 = vmul.f32 1.442695, %v550_v61  ;;  %v548_v33 = vmul.f32 1.442695, %v547_v29  ;;  %v829_v61 = vsub.f32 %v1168_v22, %v828_v36 }
 0x345   :  { %v655_v29 = vmul.f32 0.8, %v1187_v59 }
 0x346   :  { %953 = vpow2.f32 %v600_v56 }
 0x347   :  { %955 = vpow2.f32 %v551_v62 }
 0x348   :  { %957 = vrsqrt.f32 %v732_v32 }
 0x349   :  { %959 = vpow2.f32 %v548_v33 }
 0x34c   :  { %v954_v57 = vpop.eup %953 }
 0x34d   :  { %603 = vrot.lane.b32.xlu1 %v954_v57, %s988_s5  ;;  %v956_v63 = vpop.eup %955 }
 0x34e   :  { %v553_v0 = vsel %vm542_vm12, %v956_v63, 0.0  ;;  %v958_v35 = vpop.eup %957 }
 0x34f   :  { %v960_v38 = vpop.eup %959  ;;  %v734_v42 = vmul.f32 %v958_v35, %v732_v32 }
 0x351   :  { %v735_v44 = vmul.f32 %v958_v35, %v734_v42 }
 0x352   :  { %v662_v16 = vpop.permute.xlu0 %661 }
 0x353   :  { %v664_v19 = vadd.f32 %v662_v16, %v658_v17  ;;  %v736_v49 = vmul.f32 0.5, %v735_v44 }
 0x355   :  { %v665_v21 = vsel %vm542_vm12, %v664_v19, -inf  ;;  %v737_v58 = vsub.f32 1.5, %v736_v49  ;;  %v596_v19 = vsub.f32 %v1181_v52, %v1184_v54 }
 0x357   :  { %v738_v1 = vmul.f32 %v958_v35, %v737_v58 }
 0x359   :  { %v739_v6 = vmul.f32 %v738_v1, %v732_v32 }
 0x35b   :  { %v741_v9 = vsel %vm740_vm14, %v732_v32, %v739_v6  ;;  %v657_v32 = vadd.f32 %v656_v30, %v655_v29 }
 0x35c   :  { %v744_v22 = vsel %vm742_vm0, %v743_v23, %v741_v9 }
 0x35d   :  { %v746_v11 = vsel %vm745_vm10, %v744_v22, 0.0 }
 0x367   :  { %v563_v51 = vpop.xlane.xlu2 %562 }
 0x368   :  { %v564_v55 = vadd.f32 %v563_v51, %v1187_v59 }
 0x377   :  { %554 = vadd.xlane.f32.xlu1 %v553_v0 }
 0x37f   :  { %619 = vadd.xlane.f32.xlu1 %v618_v2  ;;  %v830_v2 = vmul.f32 %v829_v61, %v829_v61 }
 0x381   :  { %v831_v7 = vsel %vm475_vm15, %v830_v2, 0.0 }
 0x382   :  { %v832_v8 = vrot.slane %v831_v7, 4 }
 0x384   :  { %v833_v10 = vadd.f32 %v832_v8, %v831_v7 }
 0x3bf   :  { %v604_v12 = vpop.permute.xlu1 %603 }
 0x3c0   :  { %v606_v14 = vsel %vm542_vm12, %v604_v12, 0.0  ;;  %v834_v12 = vrot.slane %v833_v10, 2 }
 0x3c1   :  { %607 = vadd.xlane.f32.xlu0 %v606_v14 }
 0x3c2   :  { %v835_v13 = vadd.f32 %v834_v12, %v833_v10 }
 0x3c4   :  { %v836_v14 = vrot.slane %v835_v13, 1 }
 0x3c6   :  { %v837_v16 = vadd.f32 %v836_v14, %v835_v13 }
 0x3c8   :  { %v838_v17 = vmul.f32 %v837_v16, %v1172_v15 }
 0x3c9   :  { %666 = vmax.xlane.f32.xlu0 %v665_v21  ;;  %v597_v21 = vmul.f32 1.442695, %v596_v19 }
 0x3ca   :  { %vm846_vm1 = vcmp.eq.f32.partialorder %v838_v17, inf  ;;  %v849_v44 = vand.u32 2147483648, %v838_v17  ;;  %vm848_vm2 = vcmp.eq.f32.partialorder %v838_v17, 0.0 }
 0x3ea   :  { %v555_v39 = vpop.xlane.xlu1 %554 }
 0x3eb   :  { %v556_v40 = vadd.f32 %v960_v38, %v555_v39 }
 0x3ed   :  { %961 = vlog2.f32 %v556_v40 }
 0x3ee   :  { %963 = vrsqrt.f32 %v838_v17 }
 0x3ef   :  { %965 = vpow2.f32 %v597_v21 }
 0x3f2   :  { %v620_v38 = vpop.xlane.xlu1 %619 }
 0x3f3   :  { %v962_v47 = vpop.eup %961 }
 0x3f4   :  { %v558_v48 = vmul.f32 0.6931472, %v962_v47  ;;  %v964_v18 = vpop.eup %963 }
 0x3f5   :  { %v840_v20 = vmul.f32 %v964_v18, %v838_v17  ;;  %v966_v26 = vpop.eup %965 }
 0x3f6   :  { %v559_v53 = vadd.f32 %v558_v48, %v546_v60 }
 0x3f7   :  { %v841_v24 = vmul.f32 %v964_v18, %v840_v20 }
 0x3f8   :  { %v565_v56 = vmul.f32 65.0, %v559_v53  ;;  %v560_v57 = vsub.f32 %v1187_v59, %v559_v53  ;;  %v621_v59 = vadd.f32 %v620_v38, %v1181_v52 }
 0x3f9   :  { %v842_v25 = vmul.f32 0.5, %v841_v24 }
 0x3fa   :  { %v566_v62 = vsub.f32 %v564_v55, %v565_v56  ;;  %v567_v63 = vmul.f32 0.9, %v560_v57 }
 0x3fb   :  { %v843_v28 = vsub.f32 1.5, %v842_v25 }
 0x3fc   :  { %v568_v0 = vmul.f32 0.0015384615, %v566_v62 }
 0x3fd   :  { %v844_v15 = vmul.f32 %v964_v18, %v843_v28 }
 0x3fe   :  { %v569_v4 = vadd.f32 %v568_v0, %v567_v63  ;;  %v989_v0 = vmov 32.0  }
 0x3ff   :  { %v845_v34 = vmul.f32 %v844_v15, %v838_v17 }
 0x400   :  { %v570_v5 = vsub.f32 0.0, %v569_v4 }
 0x401   :  { %v847_v42 = vsel %vm846_vm1, %v838_v17, %v845_v34 }
 0x402   :  { %v572_v60 = vsel %vm571_vm13, %v570_v5, 0.0  ;;  %v850_v47 = vsel %vm848_vm2, %v849_v44, %v847_v42 }
 0x403   :  { %573 = vadd.xlane.f32.xlu2 %v572_v60 }
 0x40b   :  { %747 = vadd.xlane.f32.xlu2 %v746_v11 }
 0x434   :  { %v608_v27 = vpop.xlane.xlu0 %607 }
 0x435   :  { %v609_v50 = vadd.f32 %v966_v26, %v608_v27 }
 0x437   :  { %967 = vlog2.f32 %v609_v50 }
 0x438   :  { %969 = vrcp.f32 %v989_v0 }
 0x43c   :  { %v667_v33 = vpop.xlane.xlu0 %666 }
 0x43d   :  { %v968_v31 = vpop.eup %967  ;;  %vm668_vm15 = vcmp.ge.f32.partialorder %v657_v32, %v667_v33 }
 0x43e   :  { %v611_v35 = vmul.f32 0.6931472, %v968_v31  ;;  %v904_v37 = vsel %vm668_vm15, 1.0, %v985_v41  ;;  %v851_v41 = vsel %vm745_vm10, %v850_v47, 0.0  ;;  %v970_v4 = vpop.eup %969 }
 0x43f   :  { %v671_v39 = vsel %vm571_vm13, %v904_v37, 0.0  ;;  %v757_v60 = vmul.f32 32.0, %v970_v4  ;;  %vm761_vm3 = vweird.f32 %v970_v4 }
 0x440   :  { %v612_v40 = vadd.f32 %v611_v35, %v1184_v54  ;;  %672 = vadd.xlane.f32.xlu0 %v671_v39 }
 0x441   :  { %v758_v10 = vsub.f32 1.0, %v757_v60 }
 0x442   :  { %v622_v43 = vmul.f32 65.0, %v612_v40  ;;  %v613_v45 = vsub.f32 %v1181_v52, %v612_v40 }
 0x443   :  { %v759_v17 = vmul.f32 %v970_v4, %v758_v10 }
 0x444   :  { %v623_v48 = vsub.f32 %v621_v59, %v622_v43  ;;  %v624_v49 = vmul.f32 0.9, %v613_v45 }
 0x445   :  { %v760_v27 = vadd.f32 %v970_v4, %v759_v17 }
 0x446   :  { %v625_v36 = vmul.f32 0.0015384615, %v623_v48 }
 0x447   :  { %v762_v33 = vsel %vm761_vm3, %v970_v4, %v760_v27 }
 0x448   :  { %852 = vadd.xlane.f32.xlu0 %v851_v41  ;;  %v626_v51 = vadd.f32 %v625_v36, %v624_v49 }
 0x44a   :  { %v627_v53 = vsub.f32 0.0, %v626_v51 }
 0x44c   :  { %v628_v54 = vsel %vm571_vm13, %v627_v53, 0.0 }
 0x44d   :  { %629 = vadd.xlane.f32.xlu1 %v628_v54 }
 0x455   :  { %801 = vadd.xlane.f32.xlu1 %v1177_v46 }
 0x476   :  { %v574_v55 = vpop.xlane.xlu2 %573 }
 0x477   :  { %v575_v56 = vrot.slane %v574_v55, 4 }
 0x479   :  { %v576_v57 = vadd.f32 %v575_v56, %v574_v55 }
 0x47b   :  { %v577_v58 = vrot.slane %v576_v57, 2 }
 0x47d   :  { %v578_v52 = vadd.f32 %v577_v58, %v576_v57 }
 0x47e   :  { %v748_v1 = vpop.xlane.xlu2 %747 }
 0x47f   :  { %v579_v61 = vrot.slane %v578_v52, 1  ;;  %v749_v2 = vrot.slane %v748_v1, 4 }
 0x481   :  { %v580_v62 = vadd.f32 %v579_v61, %v578_v52  ;;  %v750_v6 = vadd.f32 %v749_v2, %v748_v1 }
 0x483   :  { %912 = vpush %v580_v62  ;;  %v751_v23 = vrot.slane %v750_v6, 2 }
 0x484   :  { %914 = vpush %v1162_v3 }
 0x485   :  { %v752_v14 = vadd.f32 %v751_v23, %v750_v6 }
 0x487   :  { %v753_v26 = vrot.slane %v752_v14, 1 }
 0x489   :  { %v754_v32 = vadd.f32 %v753_v26, %v752_v14 }
 0x4b3   :  { %v673_v63 = vpop.xlane.xlu0 %672 }
 0x4b4   :  { %s913_s30 = spop %912  ;;  %v674_v46 = vrot.slane %v673_v63, 4 }
 0x4b5   :  { %s1224_s7 = spop %914 }
 0x4b6   :  { %s1227_s8 = smul.f32 %s1224_s7, %s913_s30  ;;  %v675_v5 = vadd.f32 %v674_v46, %v673_v63 }
 0x4b8   :  { %694 = sst [smem:[#allocation2 + $0x1]] %s1227_s8  ;;  %v676_v3 = vrot.slane %v675_v5, 2  ;;  %s651_s12 = smul.f32 0.8, %s1227_s8 }
 0x4ba   :  { %v677_v13 = vadd.f32 %v676_v3, %v675_v5 }
 0x4bb   :  { %v853_v7 = vpop.xlane.xlu0 %852 }
 0x4bc   :  { %v854_v8 = vrot.slane %v853_v7, 4  ;;  %v678_v21 = vrot.slane %v677_v13, 1 }
 0x4be   :  { %v855_v12 = vadd.f32 %v854_v8, %v853_v7  ;;  %v679_v30 = vadd.f32 %v678_v21, %v677_v13 }
 0x4c0   :  { %v630_v9 = vpop.xlane.xlu1 %629  ;;  %v856_v19 = vrot.slane %v855_v12, 2 }
 0x4c1   :  { %v631_v22 = vrot.slane %v630_v9, 4 }
 0x4c2   :  { %v857_v29 = vadd.f32 %v856_v19, %v855_v12 }
 0x4c3   :  { %v632_v11 = vadd.f32 %v631_v22, %v630_v9 }
 0x4c4   :  { %v858_v34 = vrot.slane %v857_v29, 1 }
 0x4c5   :  { %v633_v16 = vrot.slane %v632_v11, 2 }
 0x4c6   :  { %v859_v38 = vadd.f32 %v858_v34, %v857_v29 }
 0x4c7   :  { %v634_v18 = vadd.f32 %v633_v16, %v632_v11 }
 0x4c8   :  { %v802_v20 = vpop.xlane.xlu1 %801 }
 0x4c9   :  { %v803_v24 = vrot.slane %v802_v20, 4  ;;  %v635_v25 = vrot.slane %v634_v18, 1 }
 0x4cb   :  { %v804_v50 = vadd.f32 %v803_v24, %v802_v20  ;;  %v636_v28 = vadd.f32 %v635_v25, %v634_v18 }
 0x4cd   :  { %v805_v15 = vrot.slane %v804_v50, 2  ;;  %916 = vpush %v636_v28 }
 0x4ce   :  { %918 = vpush %v679_v30 }
 0x4cf   :  { %v806_v31 = vadd.f32 %v805_v15, %v804_v50  ;;  %920 = vpush %v754_v32 }
 0x4d0   :  { %922 = vpush %v762_v33 }
 0x4d1   :  { %v807_v35 = vrot.slane %v806_v31, 1 }
 0x4d3   :  { %v808_v37 = vadd.f32 %v807_v35, %v806_v31 }
 0x4d5   :  { %924 = vpush %v808_v37 }
 0x4d6   :  { %926 = vpush %v859_v38 }
 0x4fe   :  { %s917_s13 = spop %916 }
 0x4ff   :  { %s646_s14 = smul.f32 %s917_s13, %s1224_s7  ;;  %s919_s15 = spop %918 }
 0x500   :  { %s689_s16 = smul.f32 %s919_s15, %s1224_s7  ;;  %s921_s2 = spop %920 }
 0x501   :  { %s647_s17 = ssub.f32 %s646_s14, %s1227_s8  ;;  %s652_s18 = smul.f32 0.2, %s646_s14 }
 0x502   :  { %696 = sst [smem:[#allocation2 + $0x2]] %s646_s14  ;;  %s690_s19 = smul.f32 100.0, %s689_s16 }
 0x503   :  { %s648_s20 = ssub.f32 0.0, %s647_s17  ;;  %s923_s21 = spop %922 }
 0x504   :  { %s653_s22 = sadd.f32 %s652_s18, %s651_s12  ;;  %s764_s23 = smul.f32 %s923_s21, %s921_s2 }
 0x505   :  { %s649_s3 = sadd.f32 1.0, %s648_s20 }
 0x506   :  { %700 = sst [smem:[#allocation2 + $0x4]] %s690_s19  ;;  %s925_s24 = spop %924 }
 0x507   :  { %s650_s6 = smax.f32 %s990_s25, %s649_s3  ;;  %766 = sst [smem:[#allocation2 + $0x5]] %s764_s23 }
 0x508   :  { %s654_s26 = sadd.f32 %s653_s22, %s650_s6  ;;  %s818_s4 = smul.f32 %s925_s24, %s923_s21 }
 0x509   :  { %698 = sst [smem:[#allocation2 + $0x3]] %s650_s6  ;;  %s927_s27 = spop %926 }
 0x50a   :  { %692 = sst [smem:[#allocation2]] %s654_s26  ;;  %s869_s28 = smul.f32 %s927_s27, %s923_s21 }
 0x50b   :  { %820 = sst [smem:[#allocation2 + $0x6]] %s818_s4 }
 0x50c   :  { %871 = sst [smem:[#allocation2 + $0x7]] %s869_s28 }
 0x50d   :  { %880 = dma.smem_to_vmem %s991_s0, 16, %s878_s11, [#allocation3]  }
 0x50e   :  { %983 = dma.done.wait [#allocation3], 16  }
 0x50f   :  { %984 = vsyncadd [#allocation3], 4294967280 }
 0x510   :  { %885 = sfence }
 0x511   :  { %886 = vsyncpa [#allocation3], 1 }

</bundles_post_ra>
